<compile_context>
chip_gen: v7x
topology: tpu7x:2x2x1
jax: 0.10.0
libtpu: 0.0.40
codegen_flags: <defaults>
</compile_context>

<pallas_src>
import math
import functools

import jax
import jax.numpy as jnp
from jax import lax
from jax.experimental import pallas as pl
from jax.experimental.pallas import tpu as pltpu


# ----------------------------------------------------------------------------
# helpers
# ----------------------------------------------------------------------------

def _pick_tile(n, pref):
    """Largest tile <= pref that divides n; falls back to the full extent."""
    if n <= pref:
        return n
    t = pref
    while t > 8:
        if n % t == 0:
            return t
        t //= 2
    return n


# ----------------------------------------------------------------------------
# fused RMSNorm + matmul  (QKV projection, lm_head)
# ----------------------------------------------------------------------------

def _rmsnorm_matmul_kernel(x_ref, g_ref, w_ref, o_ref, xn_ref, *, eps):
    # Normalize once per row-tile (j == 0), cache bf16 result in VMEM scratch,
    # reuse it for every output-column tile.
    @pl.when(pl.program_id(1) == 0)
    def _():
        x = x_ref[...].astype(jnp.float32)                    # (tm, K)
        var = jnp.mean(x * x, axis=-1, keepdims=True)
        xn = x * lax.rsqrt(var + eps) * g_ref[...].astype(jnp.float32)
        xn_ref[...] = xn.astype(jnp.bfloat16)

    o_ref[...] = jnp.dot(xn_ref[...], w_ref[...],
                         preferred_element_type=jnp.float32).astype(o_ref.dtype)


def rmsnorm_matmul(x, g, w, eps, *, out_dtype=jnp.float32,
                   tm_pref=256, tn_pref=512):
    """out = RMSNorm(x; g, eps) @ w.   x:(M,K) f32, g:(1,K) f32, w:(K,N) bf16."""
    M, K = x.shape
    K2, N = w.shape
    assert K == K2
    tm = _pick_tile(M, tm_pref)
    tn = _pick_tile(N, tn_pref)
    return pl.pallas_call(
        functools.partial(_rmsnorm_matmul_kernel, eps=eps),
        out_shape=jax.ShapeDtypeStruct((M, N), out_dtype),
        grid=(M // tm, N // tn),
        in_specs=[pl.BlockSpec((tm, K), lambda i, j: (i, 0)),
                  pl.BlockSpec((1, K), lambda i, j: (0, 0)),
                  pl.BlockSpec((K, tn), lambda i, j: (0, j))],
        out_specs=pl.BlockSpec((tm, tn), lambda i, j: (i, j)),
        scratch_shapes=[pltpu.VMEM((tm, K), jnp.bfloat16)],
        compiler_params=pltpu.CompilerParams(
            dimension_semantics=("parallel", "arbitrary")),
        cost_estimate=pl.CostEstimate(
            flops=2 * M * K * N, transcendentals=0,
            bytes_accessed=M * K * 4 + K * N * 2
            + M * N * jnp.dtype(out_dtype).itemsize),
    )(x, g, w)


# ----------------------------------------------------------------------------
# tiled matmul + residual add  (attention output projection)
# ----------------------------------------------------------------------------

def _matmul_add_kernel(a_ref, w_ref, r_ref, o_ref, acc_ref):
    k = pl.program_id(2)

    @pl.when(k == 0)
    def _():
        acc_ref[...] = jnp.zeros_like(acc_ref)

    acc_ref[...] += jnp.dot(a_ref[...], w_ref[...],
                            preferred_element_type=jnp.float32)

    @pl.when(k == pl.num_programs(2) - 1)
    def _():
        o_ref[...] = (acc_ref[...] + r_ref[...].astype(jnp.float32)
                      ).astype(o_ref.dtype)


def matmul_add(a, w, res, *, tm_pref=256, tn_pref=512, tk_pref=512):
    """out = a @ w + res.   a:(M,K) bf16, w:(K,N) bf16, res:(M,N) f32."""
    M, K = a.shape
    K2, N = w.shape
    assert K == K2 and res.shape == (M, N)
    tm = _pick_tile(M, tm_pref)
    tn = _pick_tile(N, tn_pref)
    tk = _pick_tile(K, tk_pref)
    return pl.pallas_call(
        _matmul_add_kernel,
        out_shape=jax.ShapeDtypeStruct((M, N), jnp.float32),
        grid=(M // tm, N // tn, K // tk),
        in_specs=[pl.BlockSpec((tm, tk), lambda i, j, k: (i, k)),
                  pl.BlockSpec((tk, tn), lambda i, j, k: (k, j)),
                  pl.BlockSpec((tm, tn), lambda i, j, k: (i, j))],
        out_specs=pl.BlockSpec((tm, tn), lambda i, j, k: (i, j)),
        scratch_shapes=[pltpu.VMEM((tm, tn), jnp.float32)],
        compiler_params=pltpu.CompilerParams(
            dimension_semantics=("parallel", "parallel", "arbitrary")),
        cost_estimate=pl.CostEstimate(
            flops=2 * M * K * N, transcendentals=0,
            bytes_accessed=M * K * 2 + K * N * 2 + 2 * M * N * 4),
    )(a, w, res)


# ----------------------------------------------------------------------------
# fused MLP block: out = x + fc2(GELU(fc1(RMSNorm(x))))
# ----------------------------------------------------------------------------

def _mlp_kernel(x_ref, g_ref, w1_ref, w2_ref, o_ref, xn_ref, acc_ref, *, eps):
    h = pl.program_id(1)

    @pl.when(h == 0)
    def _():
        x = x_ref[...].astype(jnp.float32)
        var = jnp.mean(x * x, axis=-1, keepdims=True)
        xn = x * lax.rsqrt(var + eps) * g_ref[...].astype(jnp.float32)
        xn_ref[...] = xn.astype(jnp.bfloat16)
        acc_ref[...] = jnp.zeros_like(acc_ref)

    hid = jnp.dot(xn_ref[...], w1_ref[...],
                  preferred_element_type=jnp.float32)         # (tm, th) f32
    hid = jax.nn.gelu(hid, approximate=True)                  # f32 VPU/EUP math
    acc_ref[...] += jnp.dot(hid.astype(jnp.bfloat16), w2_ref[...],
                            preferred_element_type=jnp.float32)

    @pl.when(h == pl.num_programs(1) - 1)
    def _():
        o_ref[...] = (acc_ref[...] + x_ref[...].astype(jnp.float32)
                      ).astype(o_ref.dtype)


def fused_mlp(x, g, w1, w2, eps, *, tm_pref=256, th_pref=512):
    """x:(M,D) f32, g:(1,D) f32, w1:(D,H) bf16, w2:(H,D) bf16 -> (M,D) f32."""
    M, D = x.shape
    D1, H = w1.shape
    H2, D2 = w2.shape
    assert D == D1 and H == H2 and D == D2
    tm = _pick_tile(M, tm_pref)
    th = _pick_tile(H, th_pref)
    return pl.pallas_call(
        functools.partial(_mlp_kernel, eps=eps),
        out_shape=jax.ShapeDtypeStruct((M, D), jnp.float32),
        grid=(M // tm, H // th),
        in_specs=[pl.BlockSpec((tm, D), lambda i, h: (i, 0)),
                  pl.BlockSpec((1, D), lambda i, h: (0, 0)),
                  pl.BlockSpec((D, th), lambda i, h: (0, h)),
                  pl.BlockSpec((th, D), lambda i, h: (h, 0))],
        out_specs=pl.BlockSpec((tm, D), lambda i, h: (i, 0)),
        scratch_shapes=[pltpu.VMEM((tm, D), jnp.bfloat16),
                        pltpu.VMEM((tm, D), jnp.float32)],
        compiler_params=pltpu.CompilerParams(
            dimension_semantics=("parallel", "arbitrary")),
        cost_estimate=pl.CostEstimate(
            flops=4 * M * D * H, transcendentals=M * H,
            bytes_accessed=2 * M * D * 4 + 2 * D * H * 2),
    )(x, g, w1, w2)


# ----------------------------------------------------------------------------
# flash-style causal attention (online softmax, block-level causal skipping)
# ----------------------------------------------------------------------------

def _flash_attn_kernel(q_ref, k_ref, v_ref, o_ref, m_sc, l_sc, acc_sc,
                       *, scale, tq, tkv):
    q_blk = pl.program_id(1)
    kv_blk = pl.program_id(2)

    @pl.when(kv_blk == 0)
    def _():
        m_sc[...] = jnp.full(m_sc.shape, -jnp.inf, dtype=jnp.float32)
        l_sc[...] = jnp.zeros_like(l_sc)
        acc_sc[...] = jnp.zeros_like(acc_sc)

    # skip kv blocks that are entirely above the causal diagonal
    @pl.when(kv_blk <= q_blk)
    def _():
        q = q_ref[0]                                          # (tq, hd) bf16
        k = k_ref[0]                                          # (tkv, hd) bf16
        v = v_ref[0]                                          # (tkv, hd) bf16
        s = lax.dot_general(q, k, (((1,), (1,)), ((), ())),
                            preferred_element_type=jnp.float32) * scale
        row = q_blk * tq + lax.broadcasted_iota(jnp.int32, s.shape, 0)
        col = kv_blk * tkv + lax.broadcasted_iota(jnp.int32, s.shape, 1)
        s = jnp.where(col <= row, s, jnp.float32(-1e30))      # mask in f32
        m_prev = m_sc[...]
        m_new = jnp.maximum(m_prev, jnp.max(s, axis=-1, keepdims=True))
        alpha = jnp.exp(m_prev - m_new)
        p = jnp.exp(s - m_new)
        l_sc[...] = alpha * l_sc[...] + jnp.sum(p, axis=-1, keepdims=True)
        acc_sc[...] = alpha * acc_sc[...] + jnp.dot(
            p.astype(jnp.bfloat16), v, preferred_element_type=jnp.float32)
        m_sc[...] = m_new

    @pl.when(kv_blk == pl.num_programs(2) - 1)
    def _():
        inv_l = pl.reciprocal(l_sc[...], approx=True)         # EUP slot, ~free
        o_ref[0] = (acc_sc[...] * inv_l).astype(o_ref.dtype)


def flash_attention(q, k, v, *, t_pref=256):
    """q, k, v: (B*H, S, hd) bf16 -> (B*H, S, hd) bf16, causal."""
    BH, S, hd = q.shape
    scale = 1.0 / math.sqrt(hd)
    tq = _pick_tile(S, t_pref)
    tkv = tq                      # equal q/kv tiles -> simple causal block skip
    q_spec = pl.BlockSpec((1, tq, hd), lambda b, qi, ki: (b, qi, 0))
    kv_spec = pl.BlockSpec((1, tkv, hd), lambda b, qi, ki: (b, ki, 0))
    return pl.pallas_call(
        functools.partial(_flash_attn_kernel, scale=scale, tq=tq, tkv=tkv),
        out_shape=jax.ShapeDtypeStruct((BH, S, hd), jnp.bfloat16),
        grid=(BH, S // tq, S // tkv),
        in_specs=[q_spec, kv_spec, kv_spec],
        out_specs=q_spec,
        scratch_shapes=[pltpu.VMEM((tq, 1), jnp.float32),
                        pltpu.VMEM((tq, 1), jnp.float32),
                        pltpu.VMEM((tq, hd), jnp.float32)],
        compiler_params=pltpu.CompilerParams(
            dimension_semantics=("parallel", "parallel", "arbitrary")),
        cost_estimate=pl.CostEstimate(
            flops=4 * BH * S * S * hd, transcendentals=BH * S * S,
            bytes_accessed=8 * BH * S * hd),
    )(q, k, v)


# ----------------------------------------------------------------------------
# JAX glue: rotary embedding, parameter init, full forward
# ----------------------------------------------------------------------------

def precompute_freqs(head_dim, seq_len, theta=500000.0):
    freqs = 1.0 / (theta ** (jnp.arange(0, head_dim, 2, dtype=jnp.float32)
                             / head_dim))
    t = jnp.arange(seq_len, dtype=jnp.float32)
    angles = jnp.outer(t, freqs)                 # (S, hd//2)
    return jnp.cos(angles), jnp.sin(angles)


def apply_rope(x, cos, sin):
    """x: (B, S, H, hd); interleaved-pair complex rotation (as reference).
    Math in f32; result cast back to x.dtype."""
    B, S, H, hd = x.shape
    xf = x.astype(jnp.float32).reshape(B, S, H, hd // 2, 2)
    x_re, x_im = xf[..., 0], xf[..., 1]
    c = cos[None, :, None, :]
    s = sin[None, :, None, :]
    o_re = x_re * c - x_im * s
    o_im = x_re * s + x_im * c
    return jnp.stack([o_re, o_im], axis=-1).reshape(B, S, H, hd).astype(x.dtype)


def init_params(key, vocab, dim, hidden, n_layers):
    std = 0.02
    std_res = 0.02 / math.sqrt(2 * n_layers)

    def normal_bf16(k, shape, s):
        return (s * jax.random.normal(k, shape, jnp.float32)).astype(jnp.bfloat16)

    keys = jax.random.split(key, 2 + 4 * n_layers)
    params = {
        "embed": std * jax.random.normal(keys[0], (vocab, dim), jnp.float32),
        "lm_head": normal_bf16(keys[1], (dim, vocab), std),
        "out_norm": jnp.ones((1, dim), jnp.float32),
        "layers": [],
    }
    for l in range(n_layers):
        k0, k1, k2, k3 = keys[2 + 4 * l: 6 + 4 * l]
        params["layers"].append({
            "attn_norm": jnp.ones((1, dim), jnp.float32),
            "w_qkv": normal_bf16(k0, (dim, 3 * dim), std),
            "w_out": normal_bf16(k1, (dim, dim), std_res),
            "mlp_norm": jnp.ones((1, dim), jnp.float32),
            "fc1": normal_bf16(k2, (dim, hidden), std),
            "fc2": normal_bf16(k3, (hidden, dim), std_res),
        })
    return params


def transformer_forward(params, tokens, cos, sin, n_heads, eps=1e-6):
    B, S = tokens.shape
    x = params["embed"][tokens]                  # (B, S, D) f32 embedding gather
    D = x.shape[-1]
    hd = D // n_heads

    for layer in params["layers"]:
        x2d = x.reshape(B * S, D)

        # ---- attention block: fused RMSNorm + QKV projection (bf16 out) ----
        qkv = rmsnorm_matmul(x2d, layer["attn_norm"], layer["w_qkv"], eps,
                             out_dtype=jnp.bfloat16)
        qkv = qkv.reshape(B, S, 3, n_heads, hd)
        q, k, v = qkv[:, :, 0], qkv[:, :, 1], qkv[:, :, 2]    # (B, S, H, hd) bf16
        q = apply_rope(q, cos, sin)
        k = apply_rope(k, cos, sin)
        q = q.transpose(0, 2, 1, 3).reshape(B * n_heads, S, hd)
        k = k.transpose(0, 2, 1, 3).reshape(B * n_heads, S, hd)
        v = v.transpose(0, 2, 1, 3).reshape(B * n_heads, S, hd)

        o = flash_attention(q, k, v)                          # (B*H, S, hd) bf16
        o = o.reshape(B, n_heads, S, hd).transpose(0, 2, 1, 3).reshape(B * S, D)

        # output projection fused with residual add
        x = matmul_add(o, layer["w_out"], x2d).reshape(B, S, D)

        # ---- MLP block: fused RMSNorm + fc1 + GELU + fc2 + residual --------
        x = fused_mlp(x.reshape(B * S, D), layer["mlp_norm"],
                      layer["fc1"], layer["fc2"], eps).reshape(B, S, D)

    # ---- final norm fused with lm_head projection ---------------------------
    logits = rmsnorm_matmul(x.reshape(B * S, D), params["out_norm"],
                            params["lm_head"], eps)
    return logits.reshape(B, S, -1)


# ----------------------------------------------------------------------------
# pure-JAX reference (same bf16 weights, f32 math) for a sanity check
# ----------------------------------------------------------------------------

def reference_forward(params, tokens, cos, sin, n_heads, eps=1e-6):
    B, S = tokens.shape
    x = params["embed"][tokens]
    D = x.shape[-1]
    hd = D // n_heads

    def rmsnorm(t, g):
        var = jnp.mean(t * t, axis=-1, keepdims=True)
        return t * lax.rsqrt(var + eps) * g

    causal = jnp.tril(jnp.ones((S, S), bool))
    for layer in params["layers"]:
        xn = rmsnorm(x, layer["attn_norm"][0])
        qkv = xn @ layer["w_qkv"].astype(jnp.float32)
        qkv = qkv.reshape(B, S, 3, n_heads, hd)
        q, k, v = qkv[:, :, 0], qkv[:, :, 1], qkv[:, :, 2]
        q = apply_rope(q, cos, sin)
        k = apply_rope(k, cos, sin)
        q = q.transpose(0, 2, 1, 3)
        k = k.transpose(0, 2, 1, 3)
        v = v.transpose(0, 2, 1, 3)
        s = jnp.einsum('bhqd,bhkd->bhqk', q, k) / math.sqrt(hd)
        s = jnp.where(causal, s, -jnp.inf)
        p = jax.nn.softmax(s, axis=-1)
        o = jnp.einsum('bhqk,bhkd->bhqd', p, v)
        o = o.transpose(0, 2, 1, 3).reshape(B, S, D)
        x = x + o @ layer["w_out"].astype(jnp.float32)
        xn = rmsnorm(x, layer["mlp_norm"][0])
        h = jax.nn.gelu(xn @ layer["fc1"].astype(jnp.float32), approximate=True)
        x = x + h @ layer["fc2"].astype(jnp.float32)
    xn = rmsnorm(x, params["out_norm"][0])
    return xn @ params["lm_head"].astype(jnp.float32)


# ----------------------------------------------------------------------------
# main
# ----------------------------------------------------------------------------

if __name__ == "__main__":
    # small ModelConfig: vocab_size=64, seq_len=8, dim=32, expand=2.0,
    # n_layers=2, n_heads=4, mlp='mlp'
    vocab, seq_len, dim, n_layers, n_heads = 64, 8, 32, 2, 4
    hidden = int(2.0 * dim)
    head_dim = dim // n_heads

    key = jax.random.PRNGKey(0)
    pkey, tkey = jax.random.split(key)
    params = init_params(pkey, vocab, dim, hidden, n_layers)
    cos, sin = precompute_freqs(head_dim, seq_len)

    tokens = jax.random.randint(tkey, (2, seq_len), 0, vocab, dtype=jnp.int32)

    fwd = jax.jit(functools.partial(transformer_forward, n_heads=n_heads))
    logits = fwd(params, tokens, cos, sin)
    jax.block_until_ready(logits)

    assert logits.shape == (2, seq_len, vocab), logits.shape
    assert bool(jnp.all(jnp.isfinite(logits)))

    # loose tolerance: bf16 intermediates + approx reciprocal in the kernel path
    ref = reference_forward(params, tokens, cos, sin, n_heads)
    ref = ref.reshape(2, seq_len, vocab)
    assert bool(jnp.allclose(logits, ref, atol=5e-2, rtol=5e-2)), float(
        jnp.max(jnp.abs(logits - ref)))

    print("KERNEL_OK")
</pallas_src>

<mosaic_0001>
module attributes {stable_mosaic.version = 11 : i64} {
  func.func @_rmsnorm_matmul_kernel(%arg0: i32, %arg1: i32, %arg2: memref<16x32xf32, #tpu.memory_space<vmem>>, %arg3: memref<1x32xf32, #tpu.memory_space<vmem>>, %arg4: memref<32x96xbf16, #tpu.memory_space<vmem>>, %arg5: memref<16x96xbf16, #tpu.memory_space<vmem>>, %arg6: memref<16x32xbf16, #tpu.memory_space<vmem>>) attributes {dimension_semantics = [#tpu.dimension_semantics<parallel>, #tpu.dimension_semantics<arbitrary>], iteration_bounds = array<i64: 1, 1>, scalar_prefetch = 0 : i64, scratch_operands = 1 : i64, tpu.core_type = #tpu.core_type<tc>, window_params = [{transform_indices = @transform_0, window_bounds = array<i64: 16, 32>}, {pipeline_mode = #tpu.pipeline_mode<synchronous>, transform_indices = @transform_1, window_bounds = array<i64: 1, 32>}, {transform_indices = @transform_2, window_bounds = array<i64: 32, 96>}, {transform_indices = @transform_3, window_bounds = array<i64: 16, 96>}]} {
    %c0_i32 = arith.constant 0 : i32
    %0 = arith.cmpi eq, %arg1, %c0_i32 : i32
    %1 = arith.extui %0 : i1 to i32
    %c0_i32_0 = arith.constant 0 : i32
    %2 = arith.cmpi ne, %1, %c0_i32_0 : i32
    scf.if %2 {
      %c0_6 = arith.constant 0 : index
      %c0_7 = arith.constant 0 : index
      %8 = vector.load %arg2[%c0_6, %c0_7] : memref<16x32xf32, #tpu.memory_space<vmem>>, vector<16x32xf32>
      %9 = arith.mulf %8, %8 : vector<16x32xf32>
      %cst_8 = arith.constant dense<0.000000e+00> : vector<16xf32>
      %10 = vector.multi_reduction <add>, %9, %cst_8 [1] : vector<16x32xf32> to vector<16xf32>
      %11 = vector.shape_cast %10 : vector<16xf32> to vector<16x1xf32>
      %cst_9 = arith.constant 3.200000e+01 : f32
      %12 = vector.broadcast %cst_9 : f32 to vector<16x1xf32>
      %13 = arith.divf %11, %12 : vector<16x1xf32>
      %cst_10 = arith.constant 9.99999997E-7 : f32
      %14 = vector.broadcast %cst_10 : f32 to vector<16x1xf32>
      %15 = arith.addf %13, %14 : vector<16x1xf32>
      %16 = math.rsqrt %15 : vector<16x1xf32>
      %17 = vector.broadcast %16 : vector<16x1xf32> to vector<16x32xf32>
      %18 = arith.mulf %8, %17 : vector<16x32xf32>
      %c0_11 = arith.constant 0 : index
      %c0_12 = arith.constant 0 : index
      %19 = vector.load %arg3[%c0_11, %c0_12] : memref<1x32xf32, #tpu.memory_space<vmem>>, vector<1x32xf32>
      %20 = vector.broadcast %19 : vector<1x32xf32> to vector<16x32xf32>
      %21 = arith.mulf %18, %20 : vector<16x32xf32>
      %22 = arith.truncf %21 : vector<16x32xf32> to vector<16x32xbf16>
      %c0_13 = arith.constant 0 : index
      %c0_14 = arith.constant 0 : index
      %23 = vector.load %arg6[%c0_13, %c0_14] : memref<16x32xbf16, #tpu.memory_space<vmem>>, vector<16x32xbf16>
      tpu.vector_store %arg6[%c0_13, %c0_14], %22 {strides = array<i32>} : memref<16x32xbf16, #tpu.memory_space<vmem>>, vector<16x32xbf16>,
    } else {
    }
    %c0 = arith.constant 0 : index
    %c0_1 = arith.constant 0 : index
    %3 = vector.load %arg6[%c0, %c0_1] : memref<16x32xbf16, #tpu.memory_space<vmem>>, vector<16x32xbf16>
    %c0_2 = arith.constant 0 : index
    %c0_3 = arith.constant 0 : index
    %4 = vector.load %arg4[%c0_2, %c0_3] : memref<32x96xbf16, #tpu.memory_space<vmem>>, vector<32x96xbf16>
    %cst = arith.constant dense<0.000000e+00> : vector<16x96xf32>
    %5 = tpu.matmul %3, %4, %cst {dimension_numbers = #tpu.dot_dimension_numbers<[1], [0], [0], [1], [0, 0, 1, 1], [], []>} : vector<16x32xbf16>, vector<32x96xbf16>, vector<16x96xf32> -> vector<16x96xf32>
    %6 = arith.truncf %5 : vector<16x96xf32> to vector<16x96xbf16>
    %c0_4 = arith.constant 0 : index
    %c0_5 = arith.constant 0 : index
    %7 = vector.load %arg5[%c0_4, %c0_5] : memref<16x96xbf16, #tpu.memory_space<vmem>>, vector<16x96xbf16>
    tpu.vector_store %arg5[%c0_4, %c0_5], %6 {strides = array<i32>} : memref<16x96xbf16, #tpu.memory_space<vmem>>, vector<16x96xbf16>,
    return
  }
  func.func @transform_0(%arg0: i32, %arg1: i32) -> (i32, i32) {
    %c0_i32 = arith.constant 0 : i32
    %c0_i32_0 = arith.constant 0 : i32
    return %arg0, %c0_i32 : i32, i32
  }
  func.func @transform_1(%arg0: i32, %arg1: i32) -> (i32, i32) {
    %c0_i32 = arith.constant 0 : i32
    %c0_i32_0 = arith.constant 0 : i32
    %c0_i32_1 = arith.constant 0 : i32
    return %c0_i32, %c0_i32_0 : i32, i32
  }
  func.func @transform_2(%arg0: i32, %arg1: i32) -> (i32, i32) {
    %c0_i32 = arith.constant 0 : i32
    %c0_i32_0 = arith.constant 0 : i32
    return %c0_i32, %arg1 : i32, i32
  }
  func.func @transform_3(%arg0: i32, %arg1: i32) -> (i32, i32) {
    %c0_i32 = arith.constant 0 : i32
    return %arg0, %arg1 : i32, i32
  }
}

module attributes {stable_mosaic.version = 11 : i64} {
  func.func @_flash_attn_kernel(%arg0: i32, %arg1: i32, %arg2: i32, %arg3: memref<1x8x8xbf16, #tpu.memory_space<vmem>>, %arg4: memref<1x8x8xbf16, #tpu.memory_space<vmem>>, %arg5: memref<1x8x8xbf16, #tpu.memory_space<vmem>>, %arg6: memref<1x8x8xbf16, #tpu.memory_space<vmem>>, %arg7: memref<8x1xf32, #tpu.memory_space<vmem>>, %arg8: memref<8x1xf32, #tpu.memory_space<vmem>>, %arg9: memref<8x8xf32, #tpu.memory_space<vmem>>) attributes {dimension_semantics = [#tpu.dimension_semantics<parallel>, #tpu.dimension_semantics<parallel>, #tpu.dimension_semantics<arbitrary>], iteration_bounds = array<i64: 8, 1, 1>, scalar_prefetch = 0 : i64, scratch_operands = 3 : i64, tpu.core_type = #tpu.core_type<tc>, window_params = [{transform_indices = @transform_0, window_bounds = array<i64: 1, 8, 8>}, {transform_indices = @transform_1, window_bounds = array<i64: 1, 8, 8>}, {transform_indices = @transform_2, window_bounds = array<i64: 1, 8, 8>}, {transform_indices = @transform_3, window_bounds = array<i64: 1, 8, 8>}]} {
    %c0_i32 = arith.constant 0 : i32
    %0 = arith.cmpi eq, %arg2, %c0_i32 : i32
    %1 = arith.extui %0 : i1 to i32
    %c0_i32_0 = arith.constant 0 : i32
    %2 = arith.cmpi ne, %1, %c0_i32_0 : i32
    scf.if %2 {
      %cst = arith.constant 0xFF800000 : f32
      %9 = vector.broadcast %cst : f32 to vector<8x1xf32>
      %c0 = arith.constant 0 : index
      %c0_4 = arith.constant 0 : index
      %10 = vector.load %arg7[%c0, %c0_4] : memref<8x1xf32, #tpu.memory_space<vmem>>, vector<8x1xf32>
      tpu.vector_store %arg7[%c0, %c0_4], %9 {strides = array<i32>} : memref<8x1xf32, #tpu.memory_space<vmem>>, vector<8x1xf32>,
      %cst_5 = arith.constant 0.000000e+00 : f32
      %11 = vector.broadcast %cst_5 : f32 to vector<8x1xf32>
      %c0_6 = arith.constant 0 : index
      %c0_7 = arith.constant 0 : index
      %12 = vector.load %arg8[%c0_6, %c0_7] : memref<8x1xf32, #tpu.memory_space<vmem>>, vector<8x1xf32>
      tpu.vector_store %arg8[%c0_6, %c0_7], %11 {strides = array<i32>} : memref<8x1xf32, #tpu.memory_space<vmem>>, vector<8x1xf32>,
      %cst_8 = arith.constant 0.000000e+00 : f32
      %13 = vector.broadcast %cst_8 : f32 to vector<8x8xf32>
      %c0_9 = arith.constant 0 : index
      %c0_10 = arith.constant 0 : index
      %14 = vector.load %arg9[%c0_9, %c0_10] : memref<8x8xf32, #tpu.memory_space<vmem>>, vector<8x8xf32>
      tpu.vector_store %arg9[%c0_9, %c0_10], %13 {strides = array<i32>} : memref<8x8xf32, #tpu.memory_space<vmem>>, vector<8x8xf32>,
    } else {
    }
    %3 = arith.cmpi sle, %arg2, %arg1 : i32
    %4 = arith.extui %3 : i1 to i32
    %c0_i32_1 = arith.constant 0 : i32
    %5 = arith.cmpi ne, %4, %c0_i32_1 : i32
    scf.if %5 {
      %c0 = arith.constant 0 : index
      %c0_4 = arith.constant 0 : index
      %c0_5 = arith.constant 0 : index
      %9 = vector.load %arg3[%c0, %c0_4, %c0_5] : memref<1x8x8xbf16, #tpu.memory_space<vmem>>, vector<1x8x8xbf16>
      %10 = vector.shape_cast %9 : vector<1x8x8xbf16> to vector<8x8xbf16>
      %c0_6 = arith.constant 0 : index
      %c0_7 = arith.constant 0 : index
      %c0_8 = arith.constant 0 : index
      %11 = vector.load %arg4[%c0_6, %c0_7, %c0_8] : memref<1x8x8xbf16, #tpu.memory_space<vmem>>, vector<1x8x8xbf16>
      %12 = vector.shape_cast %11 : vector<1x8x8xbf16> to vector<8x8xbf16>
      %c0_9 = arith.constant 0 : index
      %c0_10 = arith.constant 0 : index
      %c0_11 = arith.constant 0 : index
      %13 = vector.load %arg5[%c0_9, %c0_10, %c0_11] : memref<1x8x8xbf16, #tpu.memory_space<vmem>>, vector<1x8x8xbf16>
      %14 = vector.shape_cast %13 : vector<1x8x8xbf16> to vector<8x8xbf16>
      %cst = arith.constant dense<0.000000e+00> : vector<8x8xf32>
      %15 = tpu.matmul %10, %12, %cst {dimension_numbers = #tpu.dot_dimension_numbers<[1], [1], [0], [0], [0, 0, 1, 0], [], []>} : vector<8x8xbf16>, vector<8x8xbf16>, vector<8x8xf32> -> vector<8x8xf32>
      %cst_12 = arith.constant 0.353553385 : f32
      %16 = vector.broadcast %cst_12 : f32 to vector<8x8xf32>
      %17 = arith.mulf %15, %16 : vector<8x8xf32>
      %c8_i32 = arith.constant 8 : i32
      %18 = arith.muli %arg1, %c8_i32 : i32
      %19 = tpu.iota {dimensions = array<i32: 0>} : vector<8x8xi32>
      %20 = vector.broadcast %18 : i32 to vector<8x8xi32>
      %21 = arith.addi %20, %19 : vector<8x8xi32>
      %c8_i32_13 = arith.constant 8 : i32
      %22 = arith.muli %arg2, %c8_i32_13 : i32
      %23 = tpu.iota {dimensions = array<i32: 1>} : vector<8x8xi32>
      %24 = vector.broadcast %22 : i32 to vector<8x8xi32>
      %25 = arith.addi %24, %23 : vector<8x8xi32>
      %26 = arith.cmpi sle, %25, %21 : vector<8x8xi32>
      %cst_14 = arith.constant -1.000000e+30 : f32
      %27 = vector.broadcast %cst_14 : f32 to vector<8x8xf32>
      %28 = arith.select %26, %17, %27 : vector<8x8xi1>, vector<8x8xf32>
      %c0_15 = arith.constant 0 : index
      %c0_16 = arith.constant 0 : index
      %29 = vector.load %arg7[%c0_15, %c0_16] : memref<8x1xf32, #tpu.memory_space<vmem>>, vector<8x1xf32>
      %cst_17 = arith.constant dense<0xFF800000> : vector<8xf32>
      %30 = vector.multi_reduction <maximumf>, %28, %cst_17 [1] : vector<8x8xf32> to vector<8xf32>
      %31 = vector.shape_cast %30 : vector<8xf32> to vector<8x1xf32>
      %32 = arith.maximumf %29, %31 : vector<8x1xf32>
      %33 = arith.subf %29, %32 : vector<8x1xf32>
      %34 = math.exp %33 : vector<8x1xf32>
      %35 = vector.broadcast %32 : vector<8x1xf32> to vector<8x8xf32>
      %36 = arith.subf %28, %35 : vector<8x8xf32>
      %37 = math.exp %36 : vector<8x8xf32>
      %c0_18 = arith.constant 0 : index
      %c0_19 = arith.constant 0 : index
      %38 = vector.load %arg8[%c0_18, %c0_19] : memref<8x1xf32, #tpu.memory_space<vmem>>, vector<8x1xf32>
      %39 = arith.mulf %34, %38 : vector<8x1xf32>
      %cst_20 = arith.constant dense<0.000000e+00> : vector<8xf32>
      %40 = vector.multi_reduction <add>, %37, %cst_20 [1] : vector<8x8xf32> to vector<8xf32>
      %41 = vector.shape_cast %40 : vector<8xf32> to vector<8x1xf32>
      %42 = arith.addf %39, %41 : vector<8x1xf32>
      %c0_21 = arith.constant 0 : index
      %c0_22 = arith.constant 0 : index
      %43 = vector.load %arg8[%c0_21, %c0_22] : memref<8x1xf32, #tpu.memory_space<vmem>>, vector<8x1xf32>
      tpu.vector_store %arg8[%c0_21, %c0_22], %42 {strides = array<i32>} : memref<8x1xf32, #tpu.memory_space<vmem>>, vector<8x1xf32>,
      %c0_23 = arith.constant 0 : index
      %c0_24 = arith.constant 0 : index
      %44 = vector.load %arg9[%c0_23, %c0_24] : memref<8x8xf32, #tpu.memory_space<vmem>>, vector<8x8xf32>
      %45 = vector.broadcast %34 : vector<8x1xf32> to vector<8x8xf32>
      %46 = arith.mulf %45, %44 : vector<8x8xf32>
      %47 = arith.truncf %37 : vector<8x8xf32> to vector<8x8xbf16>
      %cst_25 = arith.constant dense<0.000000e+00> : vector<8x8xf32>
      %48 = tpu.matmul %47, %14, %cst_25 {dimension_numbers = #tpu.dot_dimension_numbers<[1], [0], [0], [1], [0, 0, 1, 1], [], []>} : vector<8x8xbf16>, vector<8x8xbf16>, vector<8x8xf32> -> vector<8x8xf32>
      %49 = arith.addf %46, %48 : vector<8x8xf32>
      %c0_26 = arith.constant 0 : index
      %c0_27 = arith.constant 0 : index
      %50 = vector.load %arg9[%c0_26, %c0_27] : memref<8x8xf32, #tpu.memory_space<vmem>>, vector<8x8xf32>
      tpu.vector_store %arg9[%c0_26, %c0_27], %49 {strides = array<i32>} : memref<8x8xf32, #tpu.memory_space<vmem>>, vector<8x8xf32>,
      %c0_28 = arith.constant 0 : index
      %c0_29 = arith.constant 0 : index
      %51 = vector.load %arg7[%c0_28, %c0_29] : memref<8x1xf32, #tpu.memory_space<vmem>>, vector<8x1xf32>
      tpu.vector_store %arg7[%c0_28, %c0_29], %32 {strides = array<i32>} : memref<8x1xf32, #tpu.memory_space<vmem>>, vector<8x1xf32>,
    } else {
    }
    %c0_i32_2 = arith.constant 0 : i32
    %6 = arith.cmpi eq, %arg2, %c0_i32_2 : i32
    %7 = arith.extui %6 : i1 to i32
    %c0_i32_3 = arith.constant 0 : i32
    %8 = arith.cmpi ne, %7, %c0_i32_3 : i32
    scf.if %8 {
      %c0 = arith.constant 0 : index
      %c0_4 = arith.constant 0 : index
      %9 = vector.load %arg8[%c0, %c0_4] : memref<8x1xf32, #tpu.memory_space<vmem>>, vector<8x1xf32>
      %10 = tpu.reciprocal %9 {approx = true} : vector<8x1xf32> -> vector<8x1xf32>
      %c0_5 = arith.constant 0 : index
      %c0_6 = arith.constant 0 : index
      %11 = vector.load %arg9[%c0_5, %c0_6] : memref<8x8xf32, #tpu.memory_space<vmem>>, vector<8x8xf32>
      %12 = vector.broadcast %10 : vector<8x1xf32> to vector<8x8xf32>
      %13 = arith.mulf %11, %12 : vector<8x8xf32>
      %14 = arith.truncf %13 : vector<8x8xf32> to vector<8x8xbf16>
      %c0_7 = arith.constant 0 : index
      %c0_8 = arith.constant 0 : index
      %c0_9 = arith.constant 0 : index
      %15 = vector.load %arg6[%c0_7, %c0_8, %c0_9] : memref<1x8x8xbf16, #tpu.memory_space<vmem>>, vector<1x8x8xbf16>
      %16 = vector.shape_cast %15 : vector<1x8x8xbf16> to vector<8x8xbf16>
      %17 = vector.shape_cast %14 : vector<8x8xbf16> to vector<1x8x8xbf16>
      tpu.vector_store %arg6[%c0_7, %c0_8, %c0_9], %17 {strides = array<i32>} : memref<1x8x8xbf16, #tpu.memory_space<vmem>>, vector<1x8x8xbf16>,
    } else {
    }
    return
  }
  func.func @transform_0(%arg0: i32, %arg1: i32, %arg2: i32) -> (i32, i32, i32) {
    %c0_i32 = arith.constant 0 : i32
    %c0_i32_0 = arith.constant 0 : i32
    return %arg0, %arg1, %c0_i32 : i32, i32, i32
  }
  func.func @transform_1(%arg0: i32, %arg1: i32, %arg2: i32) -> (i32, i32, i32) {
    %c0_i32 = arith.constant 0 : i32
    %c0_i32_0 = arith.constant 0 : i32
    return %arg0, %arg2, %c0_i32 : i32, i32, i32
  }
  func.func @transform_2(%arg0: i32, %arg1: i32, %arg2: i32) -> (i32, i32, i32) {
    %c0_i32 = arith.constant 0 : i32
    %c0_i32_0 = arith.constant 0 : i32
    return %arg0, %arg2, %c0_i32 : i32, i32, i32
  }
  func.func @transform_3(%arg0: i32, %arg1: i32, %arg2: i32) -> (i32, i32, i32) {
    %c0_i32 = arith.constant 0 : i32
    %c0_i32_0 = arith.constant 0 : i32
    return %arg0, %arg1, %c0_i32 : i32, i32, i32
  }
}

module attributes {stable_mosaic.version = 11 : i64} {
  func.func @_matmul_add_kernel(%arg0: i32, %arg1: i32, %arg2: i32, %arg3: memref<16x32xbf16, #tpu.memory_space<vmem>>, %arg4: memref<32x32xbf16, #tpu.memory_space<vmem>>, %arg5: memref<16x32xf32, #tpu.memory_space<vmem>>, %arg6: memref<16x32xf32, #tpu.memory_space<vmem>>, %arg7: memref<16x32xf32, #tpu.memory_space<vmem>>) attributes {dimension_semantics = [#tpu.dimension_semantics<parallel>, #tpu.dimension_semantics<parallel>, #tpu.dimension_semantics<arbitrary>], iteration_bounds = array<i64: 1, 1, 1>, scalar_prefetch = 0 : i64, scratch_operands = 1 : i64, tpu.core_type = #tpu.core_type<tc>, window_params = [{transform_indices = @transform_0, window_bounds = array<i64: 16, 32>}, {transform_indices = @transform_1, window_bounds = array<i64: 32, 32>}, {transform_indices = @transform_2, window_bounds = array<i64: 16, 32>}, {transform_indices = @transform_3, window_bounds = array<i64: 16, 32>}]} {
    %c0_i32 = arith.constant 0 : i32
    %0 = arith.cmpi eq, %arg2, %c0_i32 : i32
    %1 = arith.extui %0 : i1 to i32
    %c0_i32_0 = arith.constant 0 : i32
    %2 = arith.cmpi ne, %1, %c0_i32_0 : i32
    scf.if %2 {
      %cst_10 = arith.constant 0.000000e+00 : f32
      %12 = vector.broadcast %cst_10 : f32 to vector<16x32xf32>
      %c0_11 = arith.constant 0 : index
      %c0_12 = arith.constant 0 : index
      %13 = vector.load %arg7[%c0_11, %c0_12] : memref<16x32xf32, #tpu.memory_space<vmem>>, vector<16x32xf32>
      tpu.vector_store %arg7[%c0_11, %c0_12], %12 {strides = array<i32>} : memref<16x32xf32, #tpu.memory_space<vmem>>, vector<16x32xf32>,
    } else {
    }
    %c0 = arith.constant 0 : index
    %c0_1 = arith.constant 0 : index
    %3 = vector.load %arg7[%c0, %c0_1] : memref<16x32xf32, #tpu.memory_space<vmem>>, vector<16x32xf32>
    %c0_2 = arith.constant 0 : index
    %c0_3 = arith.constant 0 : index
    %4 = vector.load %arg3[%c0_2, %c0_3] : memref<16x32xbf16, #tpu.memory_space<vmem>>, vector<16x32xbf16>
    %c0_4 = arith.constant 0 : index
    %c0_5 = arith.constant 0 : index
    %5 = vector.load %arg4[%c0_4, %c0_5] : memref<32x32xbf16, #tpu.memory_space<vmem>>, vector<32x32xbf16>
    %cst = arith.constant dense<0.000000e+00> : vector<16x32xf32>
    %6 = tpu.matmul %4, %5, %cst {dimension_numbers = #tpu.dot_dimension_numbers<[1], [0], [0], [1], [0, 0, 1, 1], [], []>} : vector<16x32xbf16>, vector<32x32xbf16>, vector<16x32xf32> -> vector<16x32xf32>
    %7 = arith.addf %3, %6 : vector<16x32xf32>
    %c0_6 = arith.constant 0 : index
    %c0_7 = arith.constant 0 : index
    %8 = vector.load %arg7[%c0_6, %c0_7] : memref<16x32xf32, #tpu.memory_space<vmem>>, vector<16x32xf32>
    tpu.vector_store %arg7[%c0_6, %c0_7], %7 {strides = array<i32>} : memref<16x32xf32, #tpu.memory_space<vmem>>, vector<16x32xf32>,
    %c0_i32_8 = arith.constant 0 : i32
    %9 = arith.cmpi eq, %arg2, %c0_i32_8 : i32
    %10 = arith.extui %9 : i1 to i32
    %c0_i32_9 = arith.constant 0 : i32
    %11 = arith.cmpi ne, %10, %c0_i32_9 : i32
    scf.if %11 {
      %c0_10 = arith.constant 0 : index
      %c0_11 = arith.constant 0 : index
      %12 = vector.load %arg7[%c0_10, %c0_11] : memref<16x32xf32, #tpu.memory_space<vmem>>, vector<16x32xf32>
      %c0_12 = arith.constant 0 : index
      %c0_13 = arith.constant 0 : index
      %13 = vector.load %arg5[%c0_12, %c0_13] : memref<16x32xf32, #tpu.memory_space<vmem>>, vector<16x32xf32>
      %14 = arith.addf %12, %13 : vector<16x32xf32>
      %c0_14 = arith.constant 0 : index
      %c0_15 = arith.constant 0 : index
      %15 = vector.load %arg6[%c0_14, %c0_15] : memref<16x32xf32, #tpu.memory_space<vmem>>, vector<16x32xf32>
      tpu.vector_store %arg6[%c0_14, %c0_15], %14 {strides = array<i32>} : memref<16x32xf32, #tpu.memory_space<vmem>>, vector<16x32xf32>,
    } else {
    }
    return
  }
  func.func @transform_0(%arg0: i32, %arg1: i32, %arg2: i32) -> (i32, i32) {
    %c0_i32 = arith.constant 0 : i32
    return %arg0, %arg2 : i32, i32
  }
  func.func @transform_1(%arg0: i32, %arg1: i32, %arg2: i32) -> (i32, i32) {
    %c0_i32 = arith.constant 0 : i32
    return %arg2, %arg1 : i32, i32
  }
  func.func @transform_2(%arg0: i32, %arg1: i32, %arg2: i32) -> (i32, i32) {
    %c0_i32 = arith.constant 0 : i32
    return %arg0, %arg1 : i32, i32
  }
  func.func @transform_3(%arg0: i32, %arg1: i32, %arg2: i32) -> (i32, i32) {
    %c0_i32 = arith.constant 0 : i32
    return %arg0, %arg1 : i32, i32
  }
}

module attributes {stable_mosaic.version = 11 : i64} {
  func.func @_mlp_kernel(%arg0: i32, %arg1: i32, %arg2: memref<16x32xf32, #tpu.memory_space<vmem>>, %arg3: memref<1x32xf32, #tpu.memory_space<vmem>>, %arg4: memref<32x64xbf16, #tpu.memory_space<vmem>>, %arg5: memref<64x32xbf16, #tpu.memory_space<vmem>>, %arg6: memref<16x32xf32, #tpu.memory_space<vmem>>, %arg7: memref<16x32xbf16, #tpu.memory_space<vmem>>, %arg8: memref<16x32xf32, #tpu.memory_space<vmem>>) attributes {dimension_semantics = [#tpu.dimension_semantics<parallel>, #tpu.dimension_semantics<arbitrary>], iteration_bounds = array<i64: 1, 1>, scalar_prefetch = 0 : i64, scratch_operands = 2 : i64, tpu.core_type = #tpu.core_type<tc>, window_params = [{transform_indices = @transform_0, window_bounds = array<i64: 16, 32>}, {pipeline_mode = #tpu.pipeline_mode<synchronous>, transform_indices = @transform_1, window_bounds = array<i64: 1, 32>}, {transform_indices = @transform_2, window_bounds = array<i64: 32, 64>}, {transform_indices = @transform_3, window_bounds = array<i64: 64, 32>}, {transform_indices = @transform_4, window_bounds = array<i64: 16, 32>}]} {
    %c0_i32 = arith.constant 0 : i32
    %0 = arith.cmpi eq, %arg1, %c0_i32 : i32
    %1 = arith.extui %0 : i1 to i32
    %c0_i32_0 = arith.constant 0 : i32
    %2 = arith.cmpi ne, %1, %c0_i32_0 : i32
    scf.if %2 {
      %c0_17 = arith.constant 0 : index
      %c0_18 = arith.constant 0 : index
      %28 = vector.load %arg2[%c0_17, %c0_18] : memref<16x32xf32, #tpu.memory_space<vmem>>, vector<16x32xf32>
      %29 = arith.mulf %28, %28 : vector<16x32xf32>
      %cst_19 = arith.constant dense<0.000000e+00> : vector<16xf32>
      %30 = vector.multi_reduction <add>, %29, %cst_19 [1] : vector<16x32xf32> to vector<16xf32>
      %31 = vector.shape_cast %30 : vector<16xf32> to vector<16x1xf32>
      %cst_20 = arith.constant 3.200000e+01 : f32
      %32 = vector.broadcast %cst_20 : f32 to vector<16x1xf32>
      %33 = arith.divf %31, %32 : vector<16x1xf32>
      %cst_21 = arith.constant 9.99999997E-7 : f32
      %34 = vector.broadcast %cst_21 : f32 to vector<16x1xf32>
      %35 = arith.addf %33, %34 : vector<16x1xf32>
      %36 = math.rsqrt %35 : vector<16x1xf32>
      %37 = vector.broadcast %36 : vector<16x1xf32> to vector<16x32xf32>
      %38 = arith.mulf %28, %37 : vector<16x32xf32>
      %c0_22 = arith.constant 0 : index
      %c0_23 = arith.constant 0 : index
      %39 = vector.load %arg3[%c0_22, %c0_23] : memref<1x32xf32, #tpu.memory_space<vmem>>, vector<1x32xf32>
      %40 = vector.broadcast %39 : vector<1x32xf32> to vector<16x32xf32>
      %41 = arith.mulf %38, %40 : vector<16x32xf32>
      %42 = arith.truncf %41 : vector<16x32xf32> to vector<16x32xbf16>
      %c0_24 = arith.constant 0 : index
      %c0_25 = arith.constant 0 : index
      %43 = vector.load %arg7[%c0_24, %c0_25] : memref<16x32xbf16, #tpu.memory_space<vmem>>, vector<16x32xbf16>
      tpu.vector_store %arg7[%c0_24, %c0_25], %42 {strides = array<i32>} : memref<16x32xbf16, #tpu.memory_space<vmem>>, vector<16x32xbf16>,
      %cst_26 = arith.constant 0.000000e+00 : f32
      %44 = vector.broadcast %cst_26 : f32 to vector<16x32xf32>
      %c0_27 = arith.constant 0 : index
      %c0_28 = arith.constant 0 : index
      %45 = vector.load %arg8[%c0_27, %c0_28] : memref<16x32xf32, #tpu.memory_space<vmem>>, vector<16x32xf32>
      tpu.vector_store %arg8[%c0_27, %c0_28], %44 {strides = array<i32>} : memref<16x32xf32, #tpu.memory_space<vmem>>, vector<16x32xf32>,
    } else {
    }
    %c0 = arith.constant 0 : index
    %c0_1 = arith.constant 0 : index
    %3 = vector.load %arg7[%c0, %c0_1] : memref<16x32xbf16, #tpu.memory_space<vmem>>, vector<16x32xbf16>
    %c0_2 = arith.constant 0 : index
    %c0_3 = arith.constant 0 : index
    %4 = vector.load %arg4[%c0_2, %c0_3] : memref<32x64xbf16, #tpu.memory_space<vmem>>, vector<32x64xbf16>
    %cst = arith.constant dense<0.000000e+00> : vector<16x64xf32>
    %5 = tpu.matmul %3, %4, %cst {dimension_numbers = #tpu.dot_dimension_numbers<[1], [0], [0], [1], [0, 0, 1, 1], [], []>} : vector<16x32xbf16>, vector<32x64xbf16>, vector<16x64xf32> -> vector<16x64xf32>
    %6 = arith.mulf %5, %5 : vector<16x64xf32>
    %7 = arith.mulf %5, %6 : vector<16x64xf32>
    %cst_4 = arith.constant 4.471500e-02 : f32
    %8 = vector.broadcast %cst_4 : f32 to vector<16x64xf32>
    %9 = arith.mulf %8, %7 : vector<16x64xf32>
    %10 = arith.addf %5, %9 : vector<16x64xf32>
    %cst_5 = arith.constant 0.797884583 : f32
    %11 = vector.broadcast %cst_5 : f32 to vector<16x64xf32>
    %12 = arith.mulf %11, %10 : vector<16x64xf32>
    %13 = math.tanh %12 : vector<16x64xf32>
    %cst_6 = arith.constant 1.000000e+00 : f32
    %14 = vector.broadcast %cst_6 : f32 to vector<16x64xf32>
    %15 = arith.addf %14, %13 : vector<16x64xf32>
    %cst_7 = arith.constant 5.000000e-01 : f32
    %16 = vector.broadcast %cst_7 : f32 to vector<16x64xf32>
    %17 = arith.mulf %16, %15 : vector<16x64xf32>
    %18 = arith.mulf %5, %17 : vector<16x64xf32>
    %c0_8 = arith.constant 0 : index
    %c0_9 = arith.constant 0 : index
    %19 = vector.load %arg8[%c0_8, %c0_9] : memref<16x32xf32, #tpu.memory_space<vmem>>, vector<16x32xf32>
    %20 = arith.truncf %18 : vector<16x64xf32> to vector<16x64xbf16>
    %c0_10 = arith.constant 0 : index
    %c0_11 = arith.constant 0 : index
    %21 = vector.load %arg5[%c0_10, %c0_11] : memref<64x32xbf16, #tpu.memory_space<vmem>>, vector<64x32xbf16>
    %cst_12 = arith.constant dense<0.000000e+00> : vector<16x32xf32>
    %22 = tpu.matmul %20, %21, %cst_12 {dimension_numbers = #tpu.dot_dimension_numbers<[1], [0], [0], [1], [0, 0, 1, 1], [], []>} : vector<16x64xbf16>, vector<64x32xbf16>, vector<16x32xf32> -> vector<16x32xf32>
    %23 = arith.addf %19, %22 : vector<16x32xf32>
    %c0_13 = arith.constant 0 : index
    %c0_14 = arith.constant 0 : index
    %24 = vector.load %arg8[%c0_13, %c0_14] : memref<16x32xf32, #tpu.memory_space<vmem>>, vector<16x32xf32>
    tpu.vector_store %arg8[%c0_13, %c0_14], %23 {strides = array<i32>} : memref<16x32xf32, #tpu.memory_space<vmem>>, vector<16x32xf32>,
    %c0_i32_15 = arith.constant 0 : i32
    %25 = arith.cmpi eq, %arg1, %c0_i32_15 : i32
    %26 = arith.extui %25 : i1 to i32
    %c0_i32_16 = arith.constant 0 : i32
    %27 = arith.cmpi ne, %26, %c0_i32_16 : i32
    scf.if %27 {
      %c0_17 = arith.constant 0 : index
      %c0_18 = arith.constant 0 : index
      %28 = vector.load %arg8[%c0_17, %c0_18] : memref<16x32xf32, #tpu.memory_space<vmem>>, vector<16x32xf32>
      %c0_19 = arith.constant 0 : index
      %c0_20 = arith.constant 0 : index
      %29 = vector.load %arg2[%c0_19, %c0_20] : memref<16x32xf32, #tpu.memory_space<vmem>>, vector<16x32xf32>
      %30 = arith.addf %28, %29 : vector<16x32xf32>
      %c0_21 = arith.constant 0 : index
      %c0_22 = arith.constant 0 : index
      %31 = vector.load %arg6[%c0_21, %c0_22] : memref<16x32xf32, #tpu.memory_space<vmem>>, vector<16x32xf32>
      tpu.vector_store %arg6[%c0_21, %c0_22], %30 {strides = array<i32>} : memref<16x32xf32, #tpu.memory_space<vmem>>, vector<16x32xf32>,
    } else {
    }
    return
  }
  func.func @transform_0(%arg0: i32, %arg1: i32) -> (i32, i32) {
    %c0_i32 = arith.constant 0 : i32
    %c0_i32_0 = arith.constant 0 : i32
    return %arg0, %c0_i32 : i32, i32
  }
  func.func @transform_1(%arg0: i32, %arg1: i32) -> (i32, i32) {
    %c0_i32 = arith.constant 0 : i32
    %c0_i32_0 = arith.constant 0 : i32
    %c0_i32_1 = arith.constant 0 : i32
    return %c0_i32, %c0_i32_0 : i32, i32
  }
  func.func @transform_2(%arg0: i32, %arg1: i32) -> (i32, i32) {
    %c0_i32 = arith.constant 0 : i32
    %c0_i32_0 = arith.constant 0 : i32
    return %c0_i32, %arg1 : i32, i32
  }
  func.func @transform_3(%arg0: i32, %arg1: i32) -> (i32, i32) {
    %c0_i32 = arith.constant 0 : i32
    %c0_i32_0 = arith.constant 0 : i32
    return %arg1, %c0_i32 : i32, i32
  }
  func.func @transform_4(%arg0: i32, %arg1: i32) -> (i32, i32) {
    %c0_i32 = arith.constant 0 : i32
    %c0_i32_0 = arith.constant 0 : i32
    return %arg0, %c0_i32 : i32, i32
  }
}

module attributes {stable_mosaic.version = 11 : i64} {
  func.func @_rmsnorm_matmul_kernel(%arg0: i32, %arg1: i32, %arg2: memref<16x32xf32, #tpu.memory_space<vmem>>, %arg3: memref<1x32xf32, #tpu.memory_space<vmem>>, %arg4: memref<32x64xbf16, #tpu.memory_space<vmem>>, %arg5: memref<16x64xf32, #tpu.memory_space<vmem>>, %arg6: memref<16x32xbf16, #tpu.memory_space<vmem>>) attributes {dimension_semantics = [#tpu.dimension_semantics<parallel>, #tpu.dimension_semantics<arbitrary>], iteration_bounds = array<i64: 1, 1>, scalar_prefetch = 0 : i64, scratch_operands = 1 : i64, tpu.core_type = #tpu.core_type<tc>, window_params = [{transform_indices = @transform_0, window_bounds = array<i64: 16, 32>}, {pipeline_mode = #tpu.pipeline_mode<synchronous>, transform_indices = @transform_1, window_bounds = array<i64: 1, 32>}, {transform_indices = @transform_2, window_bounds = array<i64: 32, 64>}, {transform_indices = @transform_3, window_bounds = array<i64: 16, 64>}]} {
    %c0_i32 = arith.constant 0 : i32
    %0 = arith.cmpi eq, %arg1, %c0_i32 : i32
    %1 = arith.extui %0 : i1 to i32
    %c0_i32_0 = arith.constant 0 : i32
    %2 = arith.cmpi ne, %1, %c0_i32_0 : i32
    scf.if %2 {
      %c0_6 = arith.constant 0 : index
      %c0_7 = arith.constant 0 : index
      %7 = vector.load %arg2[%c0_6, %c0_7] : memref<16x32xf32, #tpu.memory_space<vmem>>, vector<16x32xf32>
      %8 = arith.mulf %7, %7 : vector<16x32xf32>
      %cst_8 = arith.constant dense<0.000000e+00> : vector<16xf32>
      %9 = vector.multi_reduction <add>, %8, %cst_8 [1] : vector<16x32xf32> to vector<16xf32>
      %10 = vector.shape_cast %9 : vector<16xf32> to vector<16x1xf32>
      %cst_9 = arith.constant 3.200000e+01 : f32
      %11 = vector.broadcast %cst_9 : f32 to vector<16x1xf32>
      %12 = arith.divf %10, %11 : vector<16x1xf32>
      %cst_10 = arith.constant 9.99999997E-7 : f32
      %13 = vector.broadcast %cst_10 : f32 to vector<16x1xf32>
      %14 = arith.addf %12, %13 : vector<16x1xf32>
      %15 = math.rsqrt %14 : vector<16x1xf32>
      %16 = vector.broadcast %15 : vector<16x1xf32> to vector<16x32xf32>
      %17 = arith.mulf %7, %16 : vector<16x32xf32>
      %c0_11 = arith.constant 0 : index
      %c0_12 = arith.constant 0 : index
      %18 = vector.load %arg3[%c0_11, %c0_12] : memref<1x32xf32, #tpu.memory_space<vmem>>, vector<1x32xf32>
      %19 = vector.broadcast %18 : vector<1x32xf32> to vector<16x32xf32>
      %20 = arith.mulf %17, %19 : vector<16x32xf32>
      %21 = arith.truncf %20 : vector<16x32xf32> to vector<16x32xbf16>
      %c0_13 = arith.constant 0 : index
      %c0_14 = arith.constant 0 : index
      %22 = vector.load %arg6[%c0_13, %c0_14] : memref<16x32xbf16, #tpu.memory_space<vmem>>, vector<16x32xbf16>
      tpu.vector_store %arg6[%c0_13, %c0_14], %21 {strides = array<i32>} : memref<16x32xbf16, #tpu.memory_space<vmem>>, vector<16x32xbf16>,
    } else {
    }
    %c0 = arith.constant 0 : index
    %c0_1 = arith.constant 0 : index
    %3 = vector.load %arg6[%c0, %c0_1] : memref<16x32xbf16, #tpu.memory_space<vmem>>, vector<16x32xbf16>
    %c0_2 = arith.constant 0 : index
    %c0_3 = arith.constant 0 : index
    %4 = vector.load %arg4[%c0_2, %c0_3] : memref<32x64xbf16, #tpu.memory_space<vmem>>, vector<32x64xbf16>
    %cst = arith.constant dense<0.000000e+00> : vector<16x64xf32>
    %5 = tpu.matmul %3, %4, %cst {dimension_numbers = #tpu.dot_dimension_numbers<[1], [0], [0], [1], [0, 0, 1, 1], [], []>} : vector<16x32xbf16>, vector<32x64xbf16>, vector<16x64xf32> -> vector<16x64xf32>
    %c0_4 = arith.constant 0 : index
    %c0_5 = arith.constant 0 : index
    %6 = vector.load %arg5[%c0_4, %c0_5] : memref<16x64xf32, #tpu.memory_space<vmem>>, vector<16x64xf32>
    tpu.vector_store %arg5[%c0_4, %c0_5], %5 {strides = array<i32>} : memref<16x64xf32, #tpu.memory_space<vmem>>, vector<16x64xf32>,
    return
  }
  func.func @transform_0(%arg0: i32, %arg1: i32) -> (i32, i32) {
    %c0_i32 = arith.constant 0 : i32
    %c0_i32_0 = arith.constant 0 : i32
    return %arg0, %c0_i32 : i32, i32
  }
  func.func @transform_1(%arg0: i32, %arg1: i32) -> (i32, i32) {
    %c0_i32 = arith.constant 0 : i32
    %c0_i32_0 = arith.constant 0 : i32
    %c0_i32_1 = arith.constant 0 : i32
    return %c0_i32, %c0_i32_0 : i32, i32
  }
  func.func @transform_2(%arg0: i32, %arg1: i32) -> (i32, i32) {
    %c0_i32 = arith.constant 0 : i32
    %c0_i32_0 = arith.constant 0 : i32
    return %c0_i32, %arg1 : i32, i32
  }
  func.func @transform_3(%arg0: i32, %arg1: i32) -> (i32, i32) {
    %c0_i32 = arith.constant 0 : i32
    return %arg0, %arg1 : i32, i32
  }
}

</mosaic_0001>

<bundles_post_ra>
// kernel: transformer_forward.9
= control target key start
LH: loop header
LB: loop body
LE: loop exit
PB: predicated region body
PF: predicated region fallthrough
CT: control target
= control target key end

     0   :  { %vm23_vm0 = vcmask 261120   ;;  %v154_v7 = vmov 0.0   ;;  %vm155_vm1 = vmmov 0   ;;  %vm120_vm2 = vcmask 781312   ;;  %s201_s0 = inlined_call_operand.vmem [shape: f32[16,32], index: 0, kind: input, shape index: {}]   ;;  %s202_s2 = inlined_call_operand.vmem [shape: bf16[32,96], index: 2, kind: input, shape index: {}]   ;;  %s203_s1 = inlined_call_operand.vmem [shape: f32[1,32], index: 1, kind: input, shape index: {}]   ;;  %s204_s3 = inlined_call_operand.vmem [shape: bf16[16,96], index: 3, kind: output, shape index: {}]  }
   0x1   :  { %v19_v0 = vld [vmem:[%s201_s0] sm:$0xff]  ;;  %v20_v1 = vld [vmem:[%s201_s0 + $0x8] sm:$0xff]  ;;  %138 = vmatprep.subr.bf16.mxu0 %v154_v7  ;;  %142 = vmatprep.mubr.msk.bf16.mxu0 %vm155_vm1, %v154_v7 }
   0x2   :  { %v21_v2 = vmul.f32 %v19_v0, %v19_v0  ;;  %v22_v3 = vmul.f32 %v20_v1, %v20_v1  ;;  %v148_v6 = vld [vmem:[%s202_s2] sm:$0xff]   ;;  %v149_v8 = vld [vmem:[%s202_s2 + $0x8] sm:$0xff]  }
   0x3   :  { %139 = vmatpush3.bf16.msra.mxu0 %v148_v6  ;;  %v127_v18 = vld [vmem:[%s203_s1] ss:$0 sm:$0xff] }
   0x4   :  { %v24_v4 = vsel %vm23_vm0, %v21_v2, 0.0  ;;  %v27_v5 = vsel %vm23_vm0, %v22_v3, 0.0  ;;  %140 = vmatprep.subr.bf16.mxu0 %v154_v7 }
   0x5   :  { %25 = vadd.xlane.f32.xlu0 %v24_v4 }
   0x7   :  { %141 = vmatpush3.bf16.msra.mxu0 %v149_v8 }
   0x9   :  { %28 = vadd.xlane.f32.xlu0 %v27_v5 }
  0x92   :  { %v26_v9 = vpop.xlane.xlu0 %25 }
  0x93   :  { %v31_v10 = vmul.f32 0.03125, %v26_v9 }
  0x95   :  { %v33_v11 = vadd.f32 1e-06, %v31_v10 }
  0x96   :  { %v29_v12 = vpop.xlane.xlu0 %28 }
  0x97   :  { %150 = vrsqrt.f32 %v33_v11  ;;  %v32_v13 = vmul.f32 0.03125, %v29_v12 }
  0x99   :  { %v34_v14 = vadd.f32 1e-06, %v32_v13 }
  0x9b   :  { %152 = vrsqrt.f32 %v34_v14 }
  0xa1   :  { %v151_v15 = vpop.eup %150 }
  0xa2   :  { %v37_v16 = vmul.f32 %v151_v15, %v19_v0 }
  0xa4   :  { %v46_v20 = vmul.f32 %v127_v18, %v37_v16 }
  0xa5   :  { %v153_v17 = vpop.eup %152 }
  0xa6   :  { %v38_v19 = vmul.f32 %v153_v17, %v20_v1 }
  0xa8   :  { %v47_v21 = vmul.f32 %v127_v18, %v38_v19 }
  0xaa   :  { %v48_v22 = vpack.c.bf16 %v47_v21, %v46_v20 }
  0xac   :  { %49 = vst.msk [vmem:[#allocation2] sm:$0xff] %vm23_vm0, %v48_v22 }
  0xb3   :  { %v50_v23 = vld [vmem:[#allocation2] sm:$0xff] }
  0xb4   :  { %143 = vmatmul.mubr.msk.bf16.vlgmr.msra.gmra.mrb[0].mxu0 %vm23_vm0, %v50_v23 }
 0x187   :  { %v105_v24 = vpop.f32.mrb[0].mxu0 }
 0x188   :  { %v133_v25 = vpack.c.bf16 %v105_v24, %v105_v24  ;;  %v144_v26 = vpop.f32.mrb[1].mxu0 }
 0x189   :  { %v108_v27 = vpop.f32.mrb[2].mxu0 }
 0x18a   :  { %121 = vst.msk [vmem:[%s204_s3] sm:$0xf] %vm120_vm2, %v133_v25  ;;  %v134_v28 = vpack.c.bf16 %v108_v27, %v108_v27  ;;  %v145_v29 = vpop.f32.mrb[3].mxu0 }
 0x18c   :  { %122 = vst.msk [vmem:[%s204_s3 + $0x4] sm:$0xf] %vm120_vm2, %v134_v28 }

// kernel: transformer_forward.10
= control target key start
LH: loop header
LB: loop body
LE: loop exit
PB: predicated region body
PF: predicated region fallthrough
CT: control target
= control target key end

     0   :  { %s654_s12 = smov 0   ;;  %s656_s13 = smov 0   ;;  %s710_s0 = inlined_call_operand.vmem [shape: bf16[8,8,8], index: 0, kind: input, shape index: {}]   ;;  %s711_s1 = inlined_call_operand.vmem [shape: bf16[8,8,8], index: 1, kind: input, shape index: {}]   ;;  %s712_s2 = inlined_call_operand.vmem [shape: bf16[8,8,8], index: 2, kind: input, shape index: {}]   ;;  %s713_s3 = inlined_call_operand.vmem [shape: bf16[8,8,8], index: 3, kind: output, shape index: {}]  }
   0x1   :  { %s658_s14 = smov 0  }
   0x2 LB: > { %s32_s15 = sadd.s32 1, %s624_s13  ;;  %p545_p0 = scmp.ge.s32.totalorder %s628_s14, 1  ;;  %s628_s14 = sphi %s658_s14, %s13_s14   ;;  %s624_s13 = sphi %s656_s13, %s715_s13   ;;  %s620_s12 = sphi %s654_s12, %s714_s12  }
   0x3   : > { %p34_p1 = scmp.ge.s32.totalorder %s32_s15, 8  ;;  %p190_p2 = scmp.lt.s32.totalorder %s628_s14, 9 }
   0x5   : > { %s717_s15 = smov (%p34_p1, %s32_s15), 0  ;;  %p191_p3 = pnand %p545_p0, %p190_p2 }
   0x6   : > { %p232_p4 = scmp.lt.s32.totalorder (!%p191_p3), %s620_s12, 7  ;;  %vm268_vm0 = vcmask (!%p191_p3), 64512   ;;  %v630_v0 = vmov (!%p191_p3), 0.0   ;;  %vm631_vm1 = vmmov (!%p191_p3), 0   ;;  %vm265_vm2 = vcmask (!%p191_p3), 7168  }
   0x7   : > { %194 = sbr.rel (%p191_p3) target bundleno = 826 (0x33a), region = 32  ;;  %558 = vmatprep.subr.bf16.mxu0 (!%p191_p3), %v630_v0  ;;  %269 = vst.msk [vmem:[#allocation4] sm:$0xff] (!%p191_p3), %vm268_vm0, %v630_v0  ;;  %560 = vmatprep.mubr.msk.bf16.mxu0 (!%p191_p3), %vm631_vm1, %v630_v0  ;;  %v632_v4 = vmov (!%p191_p3), -inf   ;;  %v326_v5 = vlaneseq (!%p191_p3)  ;;  %v633_v15 = vmov (!%p191_p3), 0   ;;  %vm372_vm4 = vcmask (!%p191_p3), 1043456  }
   0x8   : > { %564 = vmatprep.subr.bf16.mxu1 (!%p191_p3), %v630_v0  ;;  %566 = vmatprep.mubr.msk.bf16.mxu1 (!%p191_p3), %vm631_vm1, %v630_v0  ;;  %266 = vst.msk [vmem:[#allocation2] sm:$0xff] (!%p191_p3), %vm265_vm2, %v632_v4  ;;  %267 = vst.msk [vmem:[#allocation3] sm:$0xff] (!%p191_p3), %vm265_vm2, %v630_v0  ;;  %vm432_vm5 = vcmask (!%p191_p3), 60416  }
   0x9   : > { %v327_v6 = vshrl.u32 (!%p191_p3), %v326_v5, 7  ;;  %v332_v7 = vand.u32 (!%p191_p3), 127, %v326_v5  ;;  %598 = vset.pattern.permute.xlu0 (!%p191_p3), %v633_v15  ;;  %599 = vset.pattern.permute.xlu1 (!%p191_p3), %v633_v15 }
   0xb   : > { %vm335_vm3 = vcmp.le.s32.totalorder (!%p191_p3), %v332_v7, %v327_v6 }
   0xe   : > { %s719_s12 = smov (!%p232_p4, %s620_s12), 7  ;;  %v361_v36 = vld [vmem:[#allocation4] sm:$0xff] }
   0xf   : > { %s673_s16 = sshll.u32 %s719_s12, 2  ;;  %v337_v16 = vld [vmem:[#allocation2] sm:$0xff]  ;;  %v353_v30 = vld [vmem:[#allocation3] sm:$0xff] }
  0x10   : > { %s245_s19 = scalar_lea.vmem %s711_s1, %s673_s16  ;;  %s238_s22 = scalar_lea.vmem %s710_s0, %s673_s16 }
  0x11   : > { %v275_v1 = vld [vmem:[%s245_s19] sm:$0xf]  ;;  %s252_s25 = scalar_lea.vmem %s712_s2, %s673_s16  ;;  %s259_s28 = scalar_lea.vmem %s713_s3, %s673_s16 }
  0x12   : > { %v282_v2 = vsel %vm268_vm0, %v275_v1, 0  ;;  %v274_v3 = vld [vmem:[%s238_s22] sm:$0xf] }
  0x13   : > { %559 = vmatpush3.bf16.xpose.msra.mxu0 %v282_v2  ;;  %v276_v20 = vld [vmem:[%s252_s25] sm:$0xf] }
  0x14   : > { %v374_v21 = vsel %vm372_vm4, %v276_v20, 0 }
  0x15   : > { %565 = vmatpush3.bf16.msra.mxu1 %v374_v21 }
  0x1a   : > { %561 = vmatmul.mubr.msk.bf16.vlgmr.msra.gmra.mrb[0].mxu0 %vm268_vm0, %v274_v3 }
  0xed   : > { %v318_v8 = vpop.f32.mrb[0].mxu0 }
  0xee   : > { %v324_v9 = vmul.f32 0.35355338, %v318_v8  ;;  %v562_v10 = vpop.f32.mrb[1].mxu0 }
  0xef   : > { %v321_v11 = vpop.f32.mrb[2].mxu0 }
  0xf0   : > { %v563_v12 = vpop.f32.mrb[3].mxu0  ;;  %v336_v13 = vsel %vm335_vm3, %v324_v9, -1e+30 }
  0xf1   : > { %v338_v14 = vsel %vm268_vm0, %v336_v13, -inf }
  0xf2   : > { %339 = vmax.xlane.f32.xlu0 %v338_v14 }
 0x17f   : > { %v340_v17 = vpop.xlane.xlu0 %339 }
 0x180   : > { %v341_v18 = vmax.f32 %v337_v16, %v340_v17 }
 0x182   : > { %v342_v19 = vsub.f32 %v337_v16, %v341_v18  ;;  %418 = vst.msk [vmem:[#allocation2] sm:$0xff] %vm265_vm2, %v341_v18  ;;  %347 = vperm.xlu0 %598, %v341_v18  }
 0x184   : > { %v343_v28 = vmul.f32 1.442695, %v342_v19 }
 0x201   : > { %v348_v22 = vpop.permute.xlu0 %347 }
 0x202   : > { %v350_v23 = vsub.f32 %v336_v13, %v348_v22 }
 0x204   : > { %v351_v24 = vmul.f32 1.442695, %v350_v23 }
 0x206   : > { %600 = vpow2.f32 %v351_v24 }
 0x207   : > { %602 = vpow2.f32 %v343_v28 }
 0x210   : > { %v601_v25 = vpop.eup %600 }
 0x211   : > { %v355_v26 = vsel %vm268_vm0, %v601_v25, 0.0  ;;  %v368_v27 = vpack.c.bf16 %v601_v25, %v601_v25  ;;  %v603_v29 = vpop.eup %602 }
 0x212   : > { %356 = vadd.xlane.f32.xlu1 %v355_v26  ;;  %v354_v31 = vmul.f32 %v603_v29, %v353_v30 }
 0x213   : > { %567 = vmatmul.mubr.msk.bf16.vlgmr.msra.gmra.mrb[0].mxu1 %vm268_vm0, %v368_v27 }
 0x223   : > { %364 = vperm.xlu1 %599, %v603_v29  }
 0x29f   : > { %v357_v32 = vpop.xlane.xlu1 %356 }
 0x2a0   : > { %v358_v33 = vadd.f32 %v357_v32, %v354_v31 }
 0x2a2   : > { %360 = vst.msk [vmem:[#allocation3] sm:$0xff] %vm265_vm2, %v358_v33 }
 0x2a3   : > { %v365_v37 = vpop.permute.xlu1 %364 }
 0x2a4   : > { %v367_v38 = vmul.f32 %v365_v37, %v361_v36 }
 0x2a9   : > { %v422_v34 = vld [vmem:[#allocation3] sm:$0xff] }
 0x2aa   : > { %604 = vrcp.f32 %v422_v34 }
 0x2b4   : > { %v605_v35 = vpop.eup %604 }
 0x2b5   : > { %427 = vperm.xlu1 %599, %v605_v35  }
 0x2e6   : > { %v410_v39 = vpop.f32.mrb[0].mxu1 }
 0x2e7   : > { %v416_v40 = vadd.f32 %v410_v39, %v367_v38  ;;  %v568_v41 = vpop.f32.mrb[1].mxu1 }
 0x2e8   : > { %v413_v42 = vpop.f32.mrb[2].mxu1 }
 0x2e9   : > { %417 = vst.msk [vmem:[#allocation4] sm:$0xff] %vm268_vm0, %v416_v40  ;;  %v569_v43 = vpop.f32.mrb[3].mxu1 }
 0x2f0   : > { %v424_v44 = vld [vmem:[#allocation4] sm:$0xff] }
 0x334   : > { %v428_v45 = vpop.permute.xlu1 %427 }
 0x335   : > { %v430_v46 = vmul.f32 %v428_v45, %v424_v44 }
 0x337   : > { %v431_v47 = vpack.c.bf16 %v430_v46, %v430_v46 }
 0x339   : > { %433 = vst.msk [vmem:[%s259_s28] sm:$0xf] %vm432_vm5, %v431_v47 }
 0x33a PF: > { %s13_s14 = sadd.s32 1, %s628_s14   ;;  %s714_s12 = smov %s624_s13 }
 0x33b   : > { %p10_p5 = scmp.ge.s32.totalorder %s13_s14, 10   ;;  %s715_s13 = smov %s717_s15 }
 0x33d   :  { %12 = sbr.rel (!%p10_p5) target bundleno = 2 (0x2), region = 80 }

// kernel: transformer_forward.11
= control target key start
LH: loop header
LB: loop body
LE: loop exit
PB: predicated region body
PF: predicated region fallthrough
CT: control target
= control target key end

     0   :  { %vm19_vm0 = vcmask 261120   ;;  %v131_v0 = vmov 0.0   ;;  %vm132_vm1 = vmmov 0   ;;  %s181_s1 = inlined_call_operand.vmem [shape: bf16[32,32], index: 1, kind: input, shape index: {}]   ;;  %s182_s0 = inlined_call_operand.vmem [shape: bf16[16,32], index: 0, kind: input, shape index: {}]   ;;  %s183_s2 = inlined_call_operand.vmem [shape: f32[16,32], index: 2, kind: input, shape index: {}]   ;;  %s184_s3 = inlined_call_operand.vmem [shape: f32[16,32], index: 3, kind: output, shape index: {}]  }
   0x1   :  { %118 = vmatprep.subr.bf16.mxu0 %v131_v0  ;;  %v128_v1 = vld [vmem:[%s181_s1] sm:$0xff]   ;;  %122 = vmatprep.mubr.msk.bf16.mxu0 %vm132_vm1, %v131_v0  ;;  %20 = vst.msk [vmem:[#allocation2] sm:$0xff] %vm19_vm0, %v131_v0  ;;  %21 = vst.msk [vmem:[#allocation2 + $0x8] sm:$0xff] %vm19_vm0, %v131_v0  ;;  %v129_v2 = vld [vmem:[%s181_s1 + $0x8] sm:$0xff]  }
   0x2   :  { %119 = vmatpush3.bf16.msra.mxu0 %v128_v1  ;;  %v130_v3 = vld [vmem:[%s182_s0] sm:$0xff]   ;;  %v102_v14 = vld [vmem:[%s183_s2 + $0x8] sm:$0xff] }
   0x3   :  { %120 = vmatprep.subr.bf16.mxu0 %v131_v0  ;;  %v101_v12 = vld [vmem:[%s183_s2] sm:$0xff] }
   0x6   :  { %121 = vmatpush3.bf16.msra.mxu0 %v129_v2 }
   0x8   :  { %v22_v4 = vld [vmem:[#allocation2] sm:$0xff]  ;;  %v23_v6 = vld [vmem:[#allocation2 + $0x8] sm:$0xff] }
   0x9   :  { %123 = vmatmul.mubr.msk.bf16.vlgmr.msra.gmra.mrb[0].mxu0 %vm19_vm0, %v130_v3 }
  0xdc   :  { %v85_v5 = vpop.f32.mrb[0].mxu0 }
  0xdd   :  { %v92_v7 = vadd.f32 %v85_v5, %v22_v4  ;;  %v124_v8 = vpop.f32.mrb[1].mxu0 }
  0xde   :  { %v88_v9 = vpop.f32.mrb[2].mxu0 }
  0xdf   :  { %94 = vst.msk [vmem:[#allocation2] sm:$0xff] %vm19_vm0, %v92_v7  ;;  %v93_v10 = vadd.f32 %v88_v9, %v23_v6  ;;  %v125_v11 = vpop.f32.mrb[3].mxu0 }
  0xe1   :  { %95 = vst.msk [vmem:[#allocation2 + $0x8] sm:$0xff] %vm19_vm0, %v93_v10 }
  0xe6   :  { %v99_v13 = vld [vmem:[#allocation2] sm:$0xff] }
  0xe7   :  { %v103_v15 = vadd.f32 %v101_v12, %v99_v13 }
  0xe8   :  { %v100_v16 = vld [vmem:[#allocation2 + $0x8] sm:$0xff] }
  0xe9   :  { %105 = vst.msk [vmem:[%s184_s3] sm:$0xff] %vm19_vm0, %v103_v15  ;;  %v104_v17 = vadd.f32 %v102_v14, %v100_v16 }
  0xeb   :  { %106 = vst.msk [vmem:[%s184_s3 + $0x8] sm:$0xff] %vm19_vm0, %v104_v17 }

// kernel: transformer_forward.12
= control target key start
LH: loop header
LB: loop body
LE: loop exit
PB: predicated region body
PF: predicated region fallthrough
CT: control target
= control target key end

     0   :  { %vm26_vm0 = vcmask 261120   ;;  %v287_v7 = vmov 0.0   ;;  %vm288_vm1 = vmmov 0   ;;  %vm170_vm2 = vcmask 523264   ;;  %s369_s0 = inlined_call_operand.vmem [shape: f32[16,32], index: 0, kind: input, shape index: {}]   ;;  %s370_s2 = inlined_call_operand.vmem [shape: bf16[32,64], index: 2, kind: input, shape index: {}]   ;;  %s371_s1 = inlined_call_operand.vmem [shape: f32[1,32], index: 1, kind: input, shape index: {}]   ;;  %s372_s3 = inlined_call_operand.vmem [shape: bf16[64,32], index: 3, kind: input, shape index: {}]   ;;  %s373_s4 = inlined_call_operand.vmem [shape: f32[16,32], index: 4, kind: output, shape index: {}]  }
   0x1   :  { %v317_v0 = vld [vmem:[%s369_s0] sm:$0xff]  ;;  %v322_v1 = vld [vmem:[%s369_s0 + $0x8] sm:$0xff]  ;;  %251 = vmatprep.subr.bf16.mxu0 %v287_v7  ;;  %53 = vst.msk [vmem:[#allocation3] sm:$0xff] %vm26_vm0, %v287_v7  ;;  %54 = vst.msk [vmem:[#allocation3 + $0x8] sm:$0xff] %vm26_vm0, %v287_v7  ;;  %259 = vmatprep.subr.bf16.mxu1 %v287_v7 }
   0x2   :  { %v24_v2 = vmul.f32 %v317_v0, %v317_v0  ;;  %v25_v3 = vmul.f32 %v322_v1, %v322_v1  ;;  %v273_v6 = vld [vmem:[%s370_s2] sm:$0xff]   ;;  %v274_v8 = vld [vmem:[%s370_s2 + $0x8] sm:$0xff]   ;;  %255 = vmatprep.mubr.msk.bf16.mxu0 %vm288_vm1, %v287_v7  ;;  %267 = vmatprep.mubr.msk.bf16.mxu1 %vm288_vm1, %v287_v7  ;;  %v277_v26 = vld [vmem:[%s372_s3 + $0x10] sm:$0xff]  }
   0x3   :  { %252 = vmatpush3.bf16.msra.mxu0 %v273_v6  ;;  %v234_v18 = vld [vmem:[%s371_s1] ss:$0 sm:$0xff]  ;;  %v276_v25 = vld [vmem:[%s372_s3 + $0x8] sm:$0xff]   ;;  %v278_v27 = vld [vmem:[%s372_s3 + $0x18] sm:$0xff]  }
   0x4   :  { %v27_v4 = vsel %vm26_vm0, %v24_v2, 0.0  ;;  %v30_v5 = vsel %vm26_vm0, %v25_v3, 0.0  ;;  %253 = vmatprep.subr.bf16.mxu0 %v287_v7  ;;  %v275_v24 = vld [vmem:[%s372_s3] sm:$0xff]  }
   0x5   :  { %28 = vadd.xlane.f32.xlu0 %v27_v4  ;;  %260 = vmatpush3.bf16.msra.mxu1 %v275_v24 }
   0x6   :  { %261 = vmatprep.subr.bf16.mxu1 %v287_v7 }
   0x7   :  { %254 = vmatpush3.bf16.msra.mxu0 %v274_v8 }
   0x8   :  { %v135_v51 = vld [vmem:[#allocation3] sm:$0xff]  ;;  %v136_v53 = vld [vmem:[#allocation3 + $0x8] sm:$0xff] }
   0x9   :  { %31 = vadd.xlane.f32.xlu0 %v30_v5  ;;  %262 = vmatpush3.bf16.msra.mxu1 %v276_v25 }
   0xa   :  { %263 = vmatprep.subr.bf16.mxu1 %v287_v7 }
   0xd   :  { %264 = vmatpush3.bf16.msra.mxu1 %v277_v26 }
   0xe   :  { %265 = vmatprep.subr.bf16.mxu1 %v287_v7 }
  0x11   :  { %266 = vmatpush3.bf16.msra.mxu1 %v278_v27 }
  0x92   :  { %v29_v9 = vpop.xlane.xlu0 %28 }
  0x93   :  { %v34_v10 = vmul.f32 0.03125, %v29_v9 }
  0x95   :  { %v36_v11 = vadd.f32 1e-06, %v34_v10 }
  0x96   :  { %v32_v12 = vpop.xlane.xlu0 %31 }
  0x97   :  { %279 = vrsqrt.f32 %v36_v11  ;;  %v35_v13 = vmul.f32 0.03125, %v32_v12 }
  0x99   :  { %v37_v14 = vadd.f32 1e-06, %v35_v13 }
  0x9b   :  { %281 = vrsqrt.f32 %v37_v14 }
  0xa1   :  { %v280_v15 = vpop.eup %279 }
  0xa2   :  { %v40_v16 = vmul.f32 %v280_v15, %v317_v0 }
  0xa4   :  { %v49_v20 = vmul.f32 %v234_v18, %v40_v16 }
  0xa5   :  { %v282_v17 = vpop.eup %281 }
  0xa6   :  { %v41_v19 = vmul.f32 %v282_v17, %v322_v1 }
  0xa8   :  { %v50_v21 = vmul.f32 %v234_v18, %v41_v19 }
  0xaa   :  { %v51_v22 = vpack.c.bf16 %v50_v21, %v49_v20 }
  0xac   :  { %52 = vst.msk [vmem:[#allocation2] sm:$0xff] %vm26_vm0, %v51_v22 }
  0xb3   :  { %v55_v23 = vld [vmem:[#allocation2] sm:$0xff] }
  0xb4   :  { %256 = vmatmul.mubr.msk.bf16.vlgmr.msra.gmra.mrb[0].mxu0 %vm26_vm0, %v55_v23 }
 0x187   :  { %v110_v28 = vpop.f32.mrb[0].mxu0 }
 0x188   :  { %v117_v29 = vmul.f32 %v110_v28, %v110_v28  ;;  %v257_v30 = vpop.f32.mrb[1].mxu0 }
 0x189   :  { %v113_v31 = vpop.f32.mrb[2].mxu0 }
 0x18a   :  { %v119_v32 = vmul.f32 %v117_v29, %v110_v28  ;;  %v118_v33 = vmul.f32 %v113_v31, %v113_v31  ;;  %v258_v34 = vpop.f32.mrb[3].mxu0 }
 0x18c   :  { %v121_v35 = vmul.f32 0.044715, %v119_v32  ;;  %v120_v36 = vmul.f32 %v118_v33, %v113_v31 }
 0x18e   :  { %v123_v37 = vadd.f32 %v121_v35, %v110_v28  ;;  %v122_v38 = vmul.f32 0.044715, %v120_v36 }
 0x190   :  { %v125_v39 = vmul.f32 0.7978846, %v123_v37  ;;  %v124_v40 = vadd.f32 %v122_v38, %v113_v31 }
 0x192   :  { %283 = vtanh.f32 %v125_v39  ;;  %v126_v41 = vmul.f32 0.7978846, %v124_v40 }
 0x194   :  { %285 = vtanh.f32 %v126_v41 }
 0x19c   :  { %v284_v42 = vpop.eup %283 }
 0x19d   :  { %v129_v43 = vadd.f32 1.0, %v284_v42 }
 0x19e   :  { %v286_v44 = vpop.eup %285 }
 0x19f   :  { %v131_v45 = vmul.f32 0.5, %v129_v43  ;;  %v130_v46 = vadd.f32 1.0, %v286_v44 }
 0x1a1   :  { %v132_v47 = vmul.f32 0.5, %v130_v46  ;;  %v133_v48 = vmul.f32 %v131_v45, %v110_v28 }
 0x1a3   :  { %v134_v49 = vmul.f32 %v132_v47, %v113_v31 }
 0x1a5   :  { %v137_v50 = vpack.c.bf16 %v134_v49, %v133_v48 }
 0x1a7   :  { %268 = vmatmul.mubr.msk.bf16.vlgmr.msra.gmra.mrb[0].mxu1 %vm170_vm2, %v137_v50 }
 0x27a   :  { %v208_v52 = vpop.f32.mrb[0].mxu1 }
 0x27b   :  { %v215_v54 = vadd.f32 %v208_v52, %v135_v51  ;;  %v269_v55 = vpop.f32.mrb[1].mxu1 }
 0x27c   :  { %v211_v56 = vpop.f32.mrb[2].mxu1 }
 0x27d   :  { %217 = vst.msk [vmem:[#allocation3] sm:$0xff] %vm26_vm0, %v215_v54  ;;  %v216_v57 = vadd.f32 %v211_v56, %v136_v53  ;;  %v270_v58 = vpop.f32.mrb[3].mxu1 }
 0x27f   :  { %218 = vst.msk [vmem:[#allocation3 + $0x8] sm:$0xff] %vm26_vm0, %v216_v57 }
 0x284   :  { %v222_v59 = vld [vmem:[#allocation3] sm:$0xff] }
 0x285   :  { %v226_v60 = vadd.f32 %v222_v59, %v317_v0 }
 0x286   :  { %v223_v61 = vld [vmem:[#allocation3 + $0x8] sm:$0xff] }
 0x287   :  { %228 = vst.msk [vmem:[%s373_s4] sm:$0xff] %vm26_vm0, %v226_v60  ;;  %v227_v62 = vadd.f32 %v322_v1, %v223_v61 }
 0x289   :  { %229 = vst.msk [vmem:[%s373_s4 + $0x8] sm:$0xff] %vm26_vm0, %v227_v62 }

// kernel: transformer_forward.17
= control target key start
LH: loop header
LB: loop body
LE: loop exit
PB: predicated region body
PF: predicated region fallthrough
CT: control target
= control target key end

     0   :  { %vm24_vm0 = vcmask 261120   ;;  %s238_s0 = inlined_call_operand.vmem [shape: f32[16,32], index: 0, kind: input, shape index: {}]   ;;  %s239_s1 = inlined_call_operand.vmem [shape: f32[1,32], index: 1, kind: input, shape index: {}]   ;;  %s240_s2 = inlined_call_operand.vmem [shape: bf16[32,64], index: 2, kind: input, shape index: {}]   ;;  %s241_s3 = inlined_call_operand.hbm [shape: f32[16,64], index: 3, kind: output, shape index: {}]  }
   0x1   :  { %v20_v0 = vld [vmem:[%s238_s0] sm:$0xff]  ;;  %v21_v1 = vld [vmem:[%s238_s0 + $0x8] sm:$0xff] }
   0x2   :  { %v22_v2 = vmul.f32 %v20_v0, %v20_v0  ;;  %v23_v3 = vmul.f32 %v21_v1, %v21_v1 }
   0x3   :  { %8 = vsyncpa [#allocation4], 0  ;;  %v152_v6 = vld [vmem:[%s240_s2] sm:$0xff]   ;;  %v182_v7 = vmov 0.0   ;;  %v153_v8 = vld [vmem:[%s240_s2 + $0x8] sm:$0xff]   ;;  %vm183_vm1 = vmmov 0  }
   0x4   :  { %v25_v4 = vsel %vm24_vm0, %v22_v2, 0.0  ;;  %v28_v5 = vsel %vm24_vm0, %v23_v3, 0.0  ;;  %139 = vmatprep.subr.bf16.mxu0 %v182_v7  ;;  %143 = vmatprep.mubr.msk.bf16.mxu0 %vm183_vm1, %v182_v7  ;;  %v132_v18 = vld [vmem:[%s239_s1] ss:$0 sm:$0xff]  ;;  %s184_s2 = smov [#allocation3]   ;;  %vm113_vm2 = vcmask 523264  }
   0x5   :  { %26 = vadd.xlane.f32.xlu0 %v25_v4  ;;  %140 = vmatpush3.bf16.msra.mxu0 %v152_v6  ;;  %s121_s21 = sshll.u32 %s184_s2, 4  ;;  %s122_s21 = int_to_ptr.vmem [resolvable:$true] %s121_s21 }
   0x6   :  { %141 = vmatprep.subr.bf16.mxu0 %v182_v7  ;;  %s158_s1 = scalar_lea.vmem %s122_s21, 256  ;;  %p163_p1 = scmp.lt.s32.totalorder %s122_s21, %s122_s21 }
   0x7   :  { %p159_p0 = scmp.ne.s32.totalorder %s122_s21, %s158_s1  ;;  %p164_p2 = scmp.lt.s32.totalorder %s158_s1, %s158_s1 }
   0x9   :  { %29 = vadd.xlane.f32.xlu0 %v28_v5  ;;  %142 = vmatpush3.bf16.msra.mxu0 %v153_v8  ;;  %p165_p3 = por %p164_p2, %p163_p1 }
   0xb   :  { %p166_p4 = pnand %p165_p3, %p159_p0 }
  0x92   :  { %v27_v9 = vpop.xlane.xlu0 %26 }
  0x93   :  { %v32_v10 = vmul.f32 0.03125, %v27_v9 }
  0x95   :  { %v34_v11 = vadd.f32 1e-06, %v32_v10 }
  0x96   :  { %v30_v12 = vpop.xlane.xlu0 %29 }
  0x97   :  { %154 = vrsqrt.f32 %v34_v11  ;;  %v33_v13 = vmul.f32 0.03125, %v30_v12 }
  0x99   :  { %v35_v14 = vadd.f32 1e-06, %v33_v13 }
  0x9b   :  { %156 = vrsqrt.f32 %v35_v14 }
  0xa1   :  { %v155_v15 = vpop.eup %154 }
  0xa2   :  { %v38_v16 = vmul.f32 %v155_v15, %v20_v0 }
  0xa4   :  { %v47_v20 = vmul.f32 %v132_v18, %v38_v16 }
  0xa5   :  { %v157_v17 = vpop.eup %156 }
  0xa6   :  { %v39_v19 = vmul.f32 %v157_v17, %v21_v1 }
  0xa8   :  { %v48_v21 = vmul.f32 %v132_v18, %v39_v19 }
  0xaa   :  { %v49_v22 = vpack.c.bf16 %v48_v21, %v47_v20 }
  0xac   :  { %50 = vst.msk [vmem:[#allocation2] sm:$0xff] %vm24_vm0, %v49_v22 }
  0xb3   :  { %v51_v23 = vld [vmem:[#allocation2] sm:$0xff] }
  0xb4   :  { %144 = vmatmul.mubr.msk.bf16.vlgmr.msra.gmra.mrb[0].mxu0 %vm24_vm0, %v51_v23 }
 0x187   :  { %v106_v24 = vpop.f32.mrb[0].mxu0 }
 0x188   :  { %114 = vst.msk [vmem:[#allocation3] sm:$0xff] %vm113_vm2, %v106_v24  ;;  %v145_v25 = vpop.f32.mrb[1].mxu0 }
 0x189   :  { %v109_v26 = vpop.f32.mrb[2].mxu0 }
 0x18a   :  { %115 = vst.msk [vmem:[#allocation3 + $0x8] sm:$0xff] %vm113_vm2, %v109_v26  ;;  %v146_v27 = vpop.f32.mrb[3].mxu0 }
 0x18b   :  { %169 = shalt.err (!%p166_p4)
}
 0x18c   :  { %s170_s24 = scalar_lea.hbm %s241_s3, 256 }
 0x18d   :  { %p171_p5 = scmp.ne.s32.totalorder %s241_s3, %s170_s24  ;;  %p174_p6 = scmp.lt.u32.totalorder %s170_s24, %s241_s3 }
 0x18f   :  { %p176_p7 = pnand %p174_p6, %p171_p5 }
 0x191   :  { %179 = shalt.err (!%p176_p7)
}
 0x192   :  { %s185_s29 = smov 128   ;;  %s186_s30 = smov 8  }
 0x193   :  { %127 = dma.vmem_to_hbm [thread:$0]  %s122_s21, 256, %s241_s3, [#allocation4], %s185_s29, %s185_s29, %s186_s30  }
 0x194   :  { %180 = dma.done.wait [#allocation4], 256  }
 0x195   :  { %181 = vsyncadd [#allocation4], 4294967040 }
 0x196   :  { %131 = vsyncpa [#allocation4], 1 }

</bundles_post_ra>
